<compile_context>
chip_gen: v6e
topology: v6e:2x2x1
jax: 0.10.0
libtpu: 0.0.40
codegen_flags: <defaults>
</compile_context>

<pallas_src>
import functools
import math

import jax
import jax.numpy as jnp
from jax import lax
from jax.experimental import pallas as pl
from jax.experimental.pallas import tpu as pltpu


def _sgn_kernel(x_ref, w_ref, o_ref, *, lens_x, row_len):
    """One (channel-tile, batch) grid step.

    x_ref : (1, N, Ct)  tokens (prefix + spatial), original dtype
    w_ref : (N, Ct)     float32 gate 0.25*(w_real - 1) per spatial token,
                        zero for the lens_x prefix tokens (pass-through)
    o_ref : (1, N, Ct)  float32 output tokens
    """
    ntok = w_ref.shape[0]

    x_nat = x_ref[0, :, :]
    # Partner sums stay in bf16 when the input is bf16 (packed vregs halve the
    # roll temporaries / XLU bytes); everything else runs in f32.  The final
    # combine is always f32.
    xs = x_nat if x_nat.dtype == jnp.bfloat16 else x_nat.astype(jnp.float32)

    # Per-token spatial index t = token - lens_x; parity masks kept at (N, 1)
    # and lane-broadcast inside the selects.  Values at t < 0 (prefix) are
    # irrelevant: the gate is zero there, and no spatial token's partner ever
    # lands in the prefix (row 0 / col 0 are even -> partners at +row_len / +1;
    # odd rows/cols have t >= row_len / t >= 1 so -row_len / -1 stay spatial).
    t = lax.broadcasted_iota(jnp.int32, (ntok, 1), 0) - lens_x
    col_even = (t & 1) == 0
    # Row index t // row_len without vector integer division: (t + 0.5)/row_len
    # is never integral, so the f32 floor is exact (wrapper asserts n < 2^21).
    ridx = jnp.floor((t.astype(jnp.float32) + jnp.float32(0.5))
                     * jnp.float32(1.0 / row_len)).astype(jnp.int32)
    row_even = (ridx & 1) == 0

    # Vertical partner (+-row_len tokens), then horizontal partner (+-1 token):
    # s becomes the full 2x2 Haar block sum broadcast to every token of its
    # block.  The +-row_len roll is a whole-vreg sublane shuffle when
    # row_len % 8 == 0; the +-1 roll is the expensive cross-sublane one.
    # TODO(synk): a strided-roll even/odd pair swap could halve the +-1 XLU
    # work on v7x; kept as jnp.roll + select for guaranteed-correct lowering.
    rsum = xs + jnp.where(row_even,
                          jnp.roll(xs, -row_len, axis=0),
                          jnp.roll(xs, row_len, axis=0))
    s = rsum + jnp.where(col_even,
                         jnp.roll(rsum, -1, axis=0),
                         jnp.roll(rsum, 1, axis=0))

    # idwt2 with only the (gated) LL band changed, fused with the prefix
    # pass-through:  y = x + 0.25*(w_real - 1) * S   (gate == 0 on the prefix).
    o_ref[0, :, :] = x_nat.astype(jnp.float32) + s.astype(jnp.float32) * w_ref[...]


def _pick_channel_tile(ntok, C, x_itemsize, budget_bytes):
    """Largest channel tile whose 2x-buffered blocks + temporaries fit VMEM."""
    def footprint(ct):
        # double-buffered (input + output + weight) blocks
        # + ~4 live (N, ct) f32 roll/sum temporaries inside the kernel body.
        return ntok * ct * (2 * (x_itemsize + 4 + 4) + 4 * 4)

    # Prefer the full-C slab: each (1, N, C) block of the row-major (B, N, C)
    # input is one contiguous HBM DMA (best burst efficiency on v5e/v6e).
    if C % 128 != 0 or footprint(C) <= budget_bytes:
        return C
    for k in range(C // 128, 0, -1):
        ct = k * 128
        if C % ct == 0 and footprint(ct) <= budget_bytes:
            return ct
    return 128


def spectral_gating_forward(x, complex_weight, lens_x, spatial_size=None):
    """JAX/Pallas equivalent of SpectralGatingNetwork.forward (float32 output)."""
    B, N, C = x.shape
    n = N - lens_x
    if spatial_size is None:
        a = b = int(math.sqrt(n))
    else:
        a, b = spatial_size
    if a * b != n:
        raise ValueError(f"spatial tokens {n} do not match a*b = {a}*{b}")
    if a % 2 or b % 2:
        raise ValueError("Haar DWT2 requires even spatial dims")
    if n >= (1 << 21):
        # Keeps the in-kernel f32-floor row-parity trick exact.
        raise ValueError("too many spatial tokens for f32 row-parity trick")
    a2, b2 = a // 2, b // 2

    # Only the real part of the complex weight reaches the float32 output.
    w_real = complex_weight[..., 0].astype(jnp.float32)
    if w_real.shape != (a2, b2, C):
        raise ValueError(
            f"weight {w_real.shape} does not match LL band {(a2, b2, C)}")

    # Gating only the LL band of an orthonormal Haar DWT2 is exactly
    #   y = x + 0.25*(w_real - 1) * (2x2 block sum).
    # Pre-fold + 2x2 upsample once (weight-sized, tiny); zero rows for the
    # lens_x prefix tokens fuse the pass-through into the same aligned store.
    wm = 0.25 * (w_real - 1.0)
    w_sp = jnp.repeat(jnp.repeat(wm, 2, axis=0), 2, axis=1).reshape(n, C)
    if lens_x > 0:
        w_full = jnp.concatenate(
            [jnp.zeros((lens_x, C), jnp.float32), w_sp], axis=0)
    else:
        w_full = w_sp
    # TODO(synk): for very large N*C on v7x, ship the gate at LL resolution
    # (4x smaller) and expand 2x2 in-kernel instead of materializing (N, C).

    # Channel tiling: full C when it fits the VMEM budget, otherwise the
    # largest lane-dense (multiple-of-128) divisor of C.  Budget sized for
    # v7x's 64 MiB physical VMEM with headroom.
    ct = _pick_channel_tile(N, C, x.dtype.itemsize,
                            budget_bytes=32 * 1024 * 1024)
    if B * (C // ct) < 2 and C % 256 == 0:
        ct = C // 2        # give both v7x TensorCores a grid step
    grid = (C // ct, B)    # batch innermost -> gate tile re-used across batch

    kernel = functools.partial(_sgn_kernel, lens_x=lens_x, row_len=b)
    return pl.pallas_call(
        kernel,
        out_shape=jax.ShapeDtypeStruct((B, N, C), jnp.float32),
        grid=grid,
        in_specs=[
            pl.BlockSpec((1, N, ct), lambda j, i: (i, 0, j)),   # tokens
            pl.BlockSpec((N, ct), lambda j, i: (0, j)),         # folded gate
        ],
        out_specs=pl.BlockSpec((1, N, ct), lambda j, i: (i, 0, j)),
        compiler_params=pltpu.CompilerParams(
            dimension_semantics=("parallel", "parallel"),
            vmem_limit_bytes=48 * 1024 * 1024,
        ),
    )(x, w_full)


def _reference_forward(x, complex_weight, lens_x):
    """Pure-JAX reference (explicit Haar analysis/synthesis) for correctness."""
    B, N, C = x.shape
    z = x[:, :lens_x, :].astype(jnp.float32)
    n = N - lens_x
    a = b = int(math.sqrt(n))
    xi = x[:, lens_x:, :].reshape(B, a, b, C).astype(jnp.float32)
    w = complex_weight[..., 0].astype(jnp.float32)
    x00 = xi[:, 0::2, 0::2]
    x01 = xi[:, 0::2, 1::2]
    x10 = xi[:, 1::2, 0::2]
    x11 = xi[:, 1::2, 1::2]
    ll = (x00 + x01 + x10 + x11) * 0.5
    lh = (x00 - x01 + x10 - x11) * 0.5
    hl = (x00 + x01 - x10 - x11) * 0.5
    hh = (x00 - x01 - x10 + x11) * 0.5
    llg = ll * w[None]
    y00 = (llg + lh + hl + hh) * 0.5
    y01 = (llg - lh + hl - hh) * 0.5
    y10 = (llg + lh - hl - hh) * 0.5
    y11 = (llg - lh - hl + hh) * 0.5
    yi = jnp.zeros((B, a, b, C), jnp.float32)
    yi = yi.at[:, 0::2, 0::2].set(y00).at[:, 0::2, 1::2].set(y01)
    yi = yi.at[:, 1::2, 0::2].set(y10).at[:, 1::2, 1::2].set(y11)
    return jnp.concatenate([z, yi.reshape(B, n, C)], axis=1)


if __name__ == "__main__":
    # Small shapes consistent with the module: tokens = lens_x + a*b.
    # C=128 keeps the lane axis dense (like the real dim=768, a multiple of 128).
    B, lens_x, a, b, C = 2, 8, 8, 8, 128
    n = a * b
    N = lens_x + n
    # __init__ shape: (h, w//2+1, dim, 2); pick h, w, dim so the gate matches
    # the LL band (a//2, b//2, C).
    h, w, dim = a // 2, b - 2, C     # w//2 + 1 == b//2

    key = jax.random.PRNGKey(0)
    kx, kw = jax.random.split(key)
    x = jax.random.normal(kx, (B, N, C), dtype=jnp.float32)
    complex_weight = jax.random.normal(
        kw, (h, w // 2 + 1, dim, 2), dtype=jnp.float32) * 0.02

    fwd = jax.jit(spectral_gating_forward, static_argnums=(2,))
    out = jax.block_until_ready(fwd(x, complex_weight, lens_x))

    ref = _reference_forward(x, complex_weight, lens_x)
    assert out.shape == (B, N, C), out.shape
    assert jnp.allclose(out, ref, atol=1e-5, rtol=1e-5), "mismatch vs reference"

    print("KERNEL_OK")
</pallas_src>

<mosaic_0001>
module attributes {stable_mosaic.version = 11 : i64} {
  func.func @_sgn_kernel(%arg0: i32, %arg1: i32, %arg2: memref<1x72x128xf32, #tpu.memory_space<vmem>>, %arg3: memref<72x128xf32, #tpu.memory_space<vmem>>, %arg4: memref<1x72x128xf32, #tpu.memory_space<vmem>>) attributes {dimension_semantics = [#tpu.dimension_semantics<parallel>, #tpu.dimension_semantics<parallel>], iteration_bounds = array<i64: 1, 2>, scalar_prefetch = 0 : i64, scratch_operands = 0 : i64, tpu.core_type = #tpu.core_type<tc>, window_params = [{transform_indices = @transform_0, window_bounds = array<i64: 1, 72, 128>}, {transform_indices = @transform_1, window_bounds = array<i64: 72, 128>}, {transform_indices = @transform_2, window_bounds = array<i64: 1, 72, 128>}]} {
    %c0 = arith.constant 0 : index
    %c0_0 = arith.constant 0 : index
    %c0_1 = arith.constant 0 : index
    %0 = vector.load %arg2[%c0, %c0_0, %c0_1] : memref<1x72x128xf32, #tpu.memory_space<vmem>>, vector<1x72x128xf32>
    %1 = vector.shape_cast %0 : vector<1x72x128xf32> to vector<72x128xf32>
    %2 = tpu.iota {dimensions = array<i32: 0>} : vector<72x1xi32>
    %c8_i32 = arith.constant 8 : i32
    %3 = vector.broadcast %c8_i32 : i32 to vector<72x1xi32>
    %4 = arith.subi %2, %3 : vector<72x1xi32>
    %c1_i32 = arith.constant 1 : i32
    %5 = vector.broadcast %c1_i32 : i32 to vector<72x1xi32>
    %6 = arith.andi %4, %5 : vector<72x1xi32>
    %c0_i32 = arith.constant 0 : i32
    %7 = vector.broadcast %c0_i32 : i32 to vector<72x1xi32>
    %8 = arith.cmpi eq, %6, %7 : vector<72x1xi32>
    %9 = arith.sitofp %4 : vector<72x1xi32> to vector<72x1xf32>
    %cst = arith.constant 5.000000e-01 : f32
    %10 = vector.broadcast %cst : f32 to vector<72x1xf32>
    %11 = arith.addf %9, %10 : vector<72x1xf32>
    %cst_2 = arith.constant 1.250000e-01 : f32
    %12 = vector.broadcast %cst_2 : f32 to vector<72x1xf32>
    %13 = arith.mulf %11, %12 : vector<72x1xf32>
    %14 = math.floor %13 : vector<72x1xf32>
    %15 = arith.fptosi %14 : vector<72x1xf32> to vector<72x1xi32>
    %c1_i32_3 = arith.constant 1 : i32
    %16 = vector.broadcast %c1_i32_3 : i32 to vector<72x1xi32>
    %17 = arith.andi %15, %16 : vector<72x1xi32>
    %c0_i32_4 = arith.constant 0 : i32
    %18 = vector.broadcast %c0_i32_4 : i32 to vector<72x1xi32>
    %19 = arith.cmpi eq, %17, %18 : vector<72x1xi32>
    %20 = vector.extract_strided_slice %1 {offsets = [8, 0], sizes = [64, 128], strides = [1, 1]} : vector<72x128xf32> to vector<64x128xf32>
    %21 = vector.extract_strided_slice %1 {offsets = [0, 0], sizes = [8, 128], strides = [1, 1]} : vector<72x128xf32> to vector<8x128xf32>
    %22 = tpu.concatenate %20, %21 in 0 : vector<64x128xf32>, vector<8x128xf32> -> vector<72x128xf32>
    %23 = vector.extract_strided_slice %1 {offsets = [64, 0], sizes = [8, 128], strides = [1, 1]} : vector<72x128xf32> to vector<8x128xf32>
    %24 = vector.extract_strided_slice %1 {offsets = [0, 0], sizes = [64, 128], strides = [1, 1]} : vector<72x128xf32> to vector<64x128xf32>
    %25 = tpu.concatenate %23, %24 in 0 : vector<8x128xf32>, vector<64x128xf32> -> vector<72x128xf32>
    %26 = vector.shape_cast %19 : vector<72x1xi1> to vector<72x1xi1>
    %27 = vector.broadcast %26 : vector<72x1xi1> to vector<72x128xi1>
    %28 = arith.select %27, %22, %25 : vector<72x128xi1>, vector<72x128xf32>
    %29 = arith.addf %1, %28 : vector<72x128xf32>
    %30 = vector.extract_strided_slice %29 {offsets = [1, 0], sizes = [71, 128], strides = [1, 1]} : vector<72x128xf32> to vector<71x128xf32>
    %31 = vector.extract_strided_slice %29 {offsets = [0, 0], sizes = [1, 128], strides = [1, 1]} : vector<72x128xf32> to vector<1x128xf32>
    %32 = tpu.concatenate %30, %31 in 0 : vector<71x128xf32>, vector<1x128xf32> -> vector<72x128xf32>
    %33 = vector.extract_strided_slice %29 {offsets = [71, 0], sizes = [1, 128], strides = [1, 1]} : vector<72x128xf32> to vector<1x128xf32>
    %34 = vector.extract_strided_slice %29 {offsets = [0, 0], sizes = [71, 128], strides = [1, 1]} : vector<72x128xf32> to vector<71x128xf32>
    %35 = tpu.concatenate %33, %34 in 0 : vector<1x128xf32>, vector<71x128xf32> -> vector<72x128xf32>
    %36 = vector.shape_cast %8 : vector<72x1xi1> to vector<72x1xi1>
    %37 = vector.broadcast %36 : vector<72x1xi1> to vector<72x128xi1>
    %38 = arith.select %37, %32, %35 : vector<72x128xi1>, vector<72x128xf32>
    %39 = arith.addf %29, %38 : vector<72x128xf32>
    %c0_5 = arith.constant 0 : index
    %c0_6 = arith.constant 0 : index
    %40 = vector.load %arg3[%c0_5, %c0_6] : memref<72x128xf32, #tpu.memory_space<vmem>>, vector<72x128xf32>
    %41 = arith.mulf %39, %40 : vector<72x128xf32>
    %42 = arith.addf %1, %41 : vector<72x128xf32>
    %c0_7 = arith.constant 0 : index
    %c0_8 = arith.constant 0 : index
    %c0_9 = arith.constant 0 : index
    %43 = vector.load %arg4[%c0_7, %c0_8, %c0_9] : memref<1x72x128xf32, #tpu.memory_space<vmem>>, vector<1x72x128xf32>
    %44 = vector.shape_cast %43 : vector<1x72x128xf32> to vector<72x128xf32>
    %45 = vector.shape_cast %42 : vector<72x128xf32> to vector<1x72x128xf32>
    tpu.vector_store %arg4[%c0_7, %c0_8, %c0_9], %45 {strides = array<i32>} : memref<1x72x128xf32, #tpu.memory_space<vmem>>, vector<1x72x128xf32>,
    return
  }
  func.func @transform_0(%arg0: i32, %arg1: i32) -> (i32, i32, i32) {
    %c0_i32 = arith.constant 0 : i32
    %c0_i32_0 = arith.constant 0 : i32
    return %arg1, %c0_i32, %arg0 : i32, i32, i32
  }
  func.func @transform_1(%arg0: i32, %arg1: i32) -> (i32, i32) {
    %c0_i32 = arith.constant 0 : i32
    %c0_i32_0 = arith.constant 0 : i32
    return %c0_i32, %arg0 : i32, i32
  }
  func.func @transform_2(%arg0: i32, %arg1: i32) -> (i32, i32, i32) {
    %c0_i32 = arith.constant 0 : i32
    %c0_i32_0 = arith.constant 0 : i32
    return %arg1, %c0_i32, %arg0 : i32, i32, i32
  }
}

</mosaic_0001>

<bundles_post_ra>
// kernel: spectral_gating_forward.1
= control target key start
LH: loop header
LB: loop body
LE: loop exit
PB: predicated region body
PF: predicated region fallthrough
CT: control target
= control target key end

     0   :  { %7 = vsyncpa [#allocation3], 0  ;;  %s1135_s0 = inlined_call_operand.vmem [shape: f32[2,72,128], index: 0, kind: input, shape index: {}]   ;;  %s1136_s1 = inlined_call_operand.vmem [shape: f32[72,128], index: 1, kind: input, shape index: {}]   ;;  %s1137_s2 = inlined_call_operand.hbm [shape: f32[2,72,128], index: 2, kind: output, shape index: {}]  }
   0x1   :  { %9 = vsyncpa [#allocation3 + $0x1], 0  ;;  %s766_s9 = smov 0   ;;  %s768_s10 = smov 0  }
   0x2   :  { %s770_s11 = smov 0   ;;  %s772_s12 = smov 0  }
   0x3   :  { %s774_s13 = smov 0   ;;  %s776_s14 = smov 0  }
   0x4 LB: > { %s574_s15 = sadd.s32 4294967295, %s746_s14   ;;  %s575_s16 = sadd.s32 4294967294, %s746_s14   ;;  %s746_s14 = sphi %s776_s14, %s15_s14   ;;  %s742_s13 = sphi %s774_s13, %s1158_s13   ;;  %s738_s12 = sphi %s772_s12, %s1157_s12   ;;  %s734_s11 = sphi %s770_s11, %s1156_s11   ;;  %s730_s10 = sphi %s768_s10, %s1155_s10   ;;  %s726_s9 = sphi %s766_s9, %s1154_s9  }
   0x5   : > { %s24_s17 = sadd.s32 1, %s742_s13  ;;  %s90_s18 = sadd.s32 1, %s734_s11 }
   0x6   : > { %p25_p0 = scmp.ge.s32.totalorder %s24_s17, 2  ;;  %p100_p1 = scmp.ne.s32.totalorder %s734_s11, %s730_s10 }
   0x7   : > { %p101_p2 = scmp.eq.s32.totalorder %s574_s15, 1  ;;  %p106_p3 = scmp.ne.s32.totalorder %s730_s10, %s726_s9 }
   0x8   : > { %s1160_s17 = smov (%p25_p0, %s24_s17), 0  ;;  %p107_p5 = scmp.eq.s32.totalorder %s575_s16, 1 }
   0x9   : > { %p806_p4 = por %p101_p2, %p100_p1  ;;  %s85_s20 = ssub.s32 %s742_s13, %s1160_s17 }
   0xa   : > { %p579_p6 = scmp.ge.s32.totalorder %s746_s14, 1  ;;  %p88_p7 = scmp.eq.s32.totalorder %s85_s20, 0 }
   0xb   : > { %p813_p8 = por %p107_p5, %p106_p3  ;;  %p143_p9 = scmp.lt.s32.totalorder %s746_s14, 3 }
   0xc   : > { %s819_s22 = scalar_select %p88_p7, %s734_s11, %s90_s18  }
   0xd   : > { %p144_p10 = pnand %p579_p6, %p143_p9 }
   0xe   : > { %p172_p11 = scmp.lt.s32.totalorder (!%p144_p10), %s738_s12, 1  ;;  %s169_s28 = sand.u32 (!%p144_p10), 1, %s730_s10  }
   0xf   : > { %147 = sbr.rel (%p144_p10) target bundleno = 97 (0x61), region = 28  ;;  %s748_s18 = smov (!%p144_p10), [#allocation2]  }
  0x10   : > { %s592_s29 = smul.u32 (!%p144_p10), 72, %s169_s28  ;;  %s674_s20 = sshll.u32 (!%p144_p10), %s748_s18, 4  ;;  %s675_s20 = int_to_ptr.vmem [resolvable:$false] %s674_s20 }
  0x11   : > { %s612_s4 = smul.u32 (!%p144_p10), 1152, %s738_s12 }
  0x12   : > { %s978_s8 = scalar_lea.vmem (!%p144_p10), [#allocation2], %s592_s29 }
  0x13   : > { %s481_s5 = sshll.u32 (!%p144_p10), %s978_s8, 4  ;;  %s1078_s15 = scalar_lea.hbm (!%p144_p10), %s1137_s2, %s612_s4  ;;  %s1080_s5 = int_to_ptr.vmem [resolvable:$true] %s481_s5 }
  0x14   : > { %v193_v0 = vlaneseq  ;;  %s840_s23 = scalar_select %p172_p11, %s738_s12, 1  ;;  %vm336_vm0 = vcmask 1046528   ;;  %vm367_vm1 = vcmask 1040384  }
  0x15   : > { %s1090_s12 = scalar_lea.sflag [#allocation3], %s169_s28  ;;  %s670_s16 = scalar_lea.vmem %s1080_s5, 1152 }
  0x16   : > { %v821_v1 = vshrl.u32 %v193_v0, 7  ;;  %s593_s24 = smul.u32 72, %s840_s23  ;;  %p671_p12 = scmp.ne.s32.totalorder %s1080_s5, %s670_s16 }
  0x17   : > { %s676_s23 = scalar_lea.vmem %s675_s20, 2304  ;;  %p677_p1 = scmp.lt.s32.totalorder %s1080_s5, %s675_s20 }
  0x18   : > { %v195_v2 = vadd.s32 16, %v821_v1  ;;  %v196_v3 = vadd.s32 24, %v821_v1  ;;  %v199_v4 = vadd.s32 48, %v821_v1  ;;  %v200_v5 = vadd.s32 56, %v821_v1  ;;  %s853_s27 = scalar_lea.vmem %s1135_s0, %s593_s24  ;;  %p672_p13 = pnand %p671_p12, %p806_p4 }
  0x19   : > { %v201_v6 = vadd.s32 64, %v821_v1  ;;  %v581_v7 = vadd.s32 4294967288, %v821_v1  ;;  %v229_v8 = vcvt.s32.f32 %v821_v1  ;;  %v211_v52 = vand.u32 1, %v821_v1  ;;  %v857_v53 = vld [vmem:[%s853_s27] sm:$0xff]  ;;  %v860_v58 = vld [vmem:[%s853_s27 + $0x8] sm:$0xff]  ;;  %v863_v59 = vld [vmem:[%s853_s27 + $0x10] sm:$0xff]  ;;  %p678_p2 = scmp.lt.s32.totalorder %s676_s23, %s670_s16 }
  0x1a   : > { %v831_v9 = vadd.s32 4294967288, %v195_v2  ;;  %v833_v10 = vadd.s32 4294967288, %v196_v3  ;;  %v835_v11 = vadd.s32 4294967288, %v199_v4  ;;  %v837_v12 = vadd.s32 4294967288, %v200_v5  ;;  %v866_v60 = vld [vmem:[%s853_s27 + $0x18] sm:$0xff]  ;;  %v874_v2 = vld [vmem:[%s853_s27 + $0x20] sm:$0xff]  ;;  %p673_p0 = pneg %p672_p13 }
  0x1b   : > { %v842_v13 = vadd.s32 4294967288, %v201_v6  ;;  %v228_v14 = vcvt.s32.f32 %v581_v7  ;;  %v238_v15 = vadd.f32 0.5, %v229_v8  ;;  %v210_v41 = vand.u32 1, %v581_v7  ;;  %v877_v3 = vld [vmem:[%s853_s27 + $0x40] sm:$0xff]  ;;  %v881_v8 = vld [vmem:[%s853_s27 + $0x38] sm:$0xff]  ;;  %p679_p3 = por %p678_p2, %p677_p1 }
  0x1c   : > { %v230_v16 = vcvt.s32.f32 %v831_v9  ;;  %v231_v17 = vcvt.s32.f32 %v833_v10  ;;  %v234_v18 = vcvt.s32.f32 %v835_v11  ;;  %v235_v19 = vcvt.s32.f32 %v837_v12 }
  0x1d   : > { %v236_v20 = vcvt.s32.f32 %v842_v13  ;;  %v237_v21 = vadd.f32 0.5, %v228_v14  ;;  %v247_v22 = vmul.f32 0.125, %v238_v15  ;;  %vm868_vm2 = vcmp.eq.s32.totalorder %v210_v41, 0  ;;  %p680_p5 = pnand %p679_p3, %p673_p0 }
  0x1e   : > { %v239_v23 = vadd.f32 0.5, %v230_v16  ;;  %v240_v24 = vadd.f32 0.5, %v231_v17  ;;  %v243_v25 = vadd.f32 0.5, %v234_v18  ;;  %v244_v26 = vadd.f32 0.5, %v235_v19  ;;  %v891_v17 = vld [vmem:[%s853_s27 + $0x28] sm:$0xff] }
  0x1f   : > { %v245_v27 = vadd.f32 0.5, %v236_v20  ;;  %v246_v28 = vmul.f32 0.125, %v237_v21  ;;  %v256_v29 = vfloor.f32 %v247_v22  ;;  %v212_v0 = vand.u32 1, %v831_v9 }
  0x20   : > { %v248_v30 = vmul.f32 0.125, %v239_v23  ;;  %v249_v31 = vmul.f32 0.125, %v240_v24  ;;  %v252_v32 = vmul.f32 0.125, %v243_v25  ;;  %v253_v33 = vmul.f32 0.125, %v244_v26  ;;  %v911_v25 = vld [vmem:[%s853_s27 + $0x30] sm:$0xff] }
  0x21   : > { %v254_v34 = vmul.f32 0.125, %v245_v27  ;;  %v255_v35 = vfloor.f32 %v246_v28  ;;  %v596_v36 = vtrunc.f32 %v256_v29  ;;  %v197_v7 = vadd.s32 32, %v821_v1 }
  0x22   : > { %v257_v37 = vfloor.f32 %v248_v30  ;;  %v258_v38 = vfloor.f32 %v249_v31  ;;  %v261_v39 = vfloor.f32 %v252_v32  ;;  %v262_v40 = vfloor.f32 %v253_v33 }
  0x23   : > { %v263_v42 = vfloor.f32 %v254_v34  ;;  %v594_v43 = vtrunc.f32 %v255_v35  ;;  %v597_v44 = vcvt.f32.s32 %v596_v36  ;;  %vm883_vm5 = vcmp.eq.s32.totalorder %v211_v52, 0 }
  0x24   : > { %v598_v45 = vtrunc.f32 %v257_v37  ;;  %v600_v46 = vtrunc.f32 %v258_v38  ;;  %v606_v47 = vtrunc.f32 %v261_v39  ;;  %v608_v48 = vtrunc.f32 %v262_v40 }
  0x25   : > { %v595_v49 = vcvt.f32.s32 %v594_v43  ;;  %v610_v50 = vtrunc.f32 %v263_v42  ;;  %v274_v51 = vand.u32 1, %v597_v44  ;;  %vm904_vm10 = vcmp.eq.s32.totalorder %v212_v0, 0 }
  0x26   : > { %v599_v54 = vcvt.f32.s32 %v598_v45  ;;  %v601_v55 = vcvt.f32.s32 %v600_v46  ;;  %v607_v56 = vcvt.f32.s32 %v606_v47  ;;  %v609_v57 = vcvt.f32.s32 %v608_v48  ;;  %v430_v46 = vld [vmem:[%s1136_s1] sm:$0xff]  ;;  %v431_v48 = vld [vmem:[%s1136_s1 + $0x8] sm:$0xff] }
  0x27   : > { %v611_v62 = vcvt.f32.s32 %v610_v50  ;;  %v273_v63 = vand.u32 1, %v595_v49  ;;  %vm283_vm3 = vcmp.eq.s32.totalorder %v274_v51, 0  ;;  %v908_v24 = vadd.s32 4294967288, %v197_v7 }
  0x28   : > { %v275_v4 = vand.u32 1, %v599_v54  ;;  %v276_v5 = vand.u32 1, %v601_v55  ;;  %v279_v6 = vand.u32 1, %v607_v56  ;;  %v280_v14 = vand.u32 1, %v609_v57  ;;  %v432_v55 = vld [vmem:[%s1136_s1 + $0x10] sm:$0xff] }
  0x29   : > { %v281_v15 = vand.u32 1, %v611_v62  ;;  %vm282_vm4 = vcmp.eq.s32.totalorder %v273_v63, 0  ;;  %v310_v9 = vsel %vm283_vm3, %v863_v59, %v857_v53  ;;  %v232_v40 = vcvt.s32.f32 %v908_v24 }
  0x2a   : > { %vm284_vm6 = vcmp.eq.s32.totalorder %v275_v4, 0  ;;  %vm285_vm7 = vcmp.eq.s32.totalorder %v276_v5, 0  ;;  %vm288_vm8 = vcmp.eq.s32.totalorder %v279_v6, 0  ;;  %v309_v18 = vsel %vm282_vm4, %v860_v58, %v877_v3 }
  0x2b   : > { %vm290_vm9 = vcmp.eq.s32.totalorder %v281_v15, 0  ;;  %v311_v19 = vsel %vm284_vm6, %v866_v60, %v860_v58  ;;  %v312_v20 = vsel %vm285_vm7, %v874_v2, %v863_v59  ;;  %v902_v22 = vadd.f32 %v309_v18, %v857_v53 }
  0x2c   : > { %v317_v21 = vsel %vm290_vm9, %v857_v53, %v881_v8  ;;  %vm289_vm11 = vcmp.eq.s32.totalorder %v280_v14, 0  ;;  %v319_v26 = vadd.f32 %v310_v9, %v860_v58  ;;  %v915_v27 = vadd.f32 %v311_v19, %v863_v59 }
  0x2d   : > { %v918_v28 = vadd.f32 %v317_v21, %v877_v3  ;;  %v315_v29 = vsel %vm288_vm8, %v881_v8, %v891_v17  ;;  %v337_v30 = vrot.slane %v902_v22, 1  ;;  %v368_v31 = vrot.slane %v902_v22, 7 }
  0x2e   : > { %v926_v32 = vadd.f32 %v312_v20, %v866_v60  ;;  %v338_v33 = vrot.slane %v319_v26, 1  ;;  %v340_v35 = vrot.slane %v915_v27, 1  ;;  %v369_v36 = vrot.slane %v319_v26, 7 }
  0x2f   : > { %v365_v34 = vrot.slane %v918_v28, 7  ;;  %v316_v37 = vsel %vm289_vm11, %v877_v3, %v911_v25  ;;  %v371_v39 = vrot.slane %v915_v27, 7  ;;  %v241_v56 = vadd.f32 0.5, %v232_v40 }
  0x30   : > { %v342_v38 = vrot.slane %v926_v32, 1  ;;  %v339_v41 = vsel %vm336_vm0, %v337_v30, %v338_v33  ;;  %v341_v43 = vsel %vm336_vm0, %v338_v33, %v340_v35  ;;  %v370_v44 = vsel %vm367_vm1, %v368_v31, %v369_v36 }
  0x31   : > { %v393_v42 = vsel %vm367_vm1, %v365_v34, %v368_v31  ;;  %v413_v47 = vsel %vm883_vm5, %v341_v43, %v370_v44  ;;  %v372_v50 = vsel %vm367_vm1, %v369_v36, %v371_v39  ;;  %v965_v57 = vadd.f32 %v316_v37, %v881_v8  ;;  %v437_v36 = vld [vmem:[%s1136_s1 + $0x38] sm:$0xff] }
  0x32   : > { %v412_v45 = vsel %vm868_vm2, %v339_v41, %v393_v42  ;;  %v343_v49 = vsel %vm336_vm0, %v340_v35, %v342_v38  ;;  %v422_v52 = vadd.f32 %v413_v47, %v319_v26  ;;  %v198_v62 = vadd.s32 40, %v821_v1  ;;  %v438_v42 = vld [vmem:[%s1136_s1 + $0x40] sm:$0xff] }
  0x33   : > { %v421_v51 = vadd.f32 %v412_v45, %v902_v22  ;;  %v414_v54 = vsel %vm904_vm10, %v343_v49, %v372_v50  ;;  %v250_v4 = vmul.f32 0.125, %v241_v56  ;;  %v970_v5 = vadd.f32 %v315_v29, %v911_v25 }
  0x34   : > { %v423_v61 = vadd.f32 %v414_v54, %v915_v27  ;;  %v440_v0 = vmul.f32 %v431_v48, %v422_v52  ;;  %v972_v7 = vadd.s32 4294967288, %v198_v62  ;;  %v350_v19 = vrot.slane %v965_v57, 1 }
  0x35   : > { %v439_v63 = vmul.f32 %v430_v46, %v421_v51  ;;  %v259_v16 = vfloor.f32 %v250_v4  ;;  %v379_v20 = vrot.slane %v970_v5, 7  ;;  %v381_v21 = vrot.slane %v965_v57, 7 }
  0x36   : > { %v441_v6 = vmul.f32 %v432_v55, %v423_v61  ;;  %v449_v15 = vadd.f32 %v440_v0, %v860_v58  ;;  %v233_v18 = vcvt.s32.f32 %v972_v7  ;;  %v218_v23 = vand.u32 1, %v842_v13 }
  0x37   : > { %v448_v14 = vadd.f32 %v439_v63, %v857_v53  ;;  %v602_v1 = vtrunc.f32 %v259_v16  ;;  %v217_v53 = vand.u32 1, %v837_v12  ;;  %v382_v31 = vsel %vm367_vm1, %v379_v20, %v381_v21 }
  0x38   : > { %v450_v9 = vadd.f32 %v441_v6, %v863_v59  ;;  %458 = vst [vmem:[%s978_s8 + $0x8] sm:$0xff] %v449_v15  ;;  %v242_v58 = vadd.f32 0.5, %v233_v18  ;;  %v352_v59 = vrot.slane %v918_v28, 1  ;;  %vm227_vm13 = vcmp.eq.s32.totalorder %v218_v23, 0 }
  0x39   : > { %457 = vst [vmem:[%s978_s8] sm:$0xff] %v448_v14  ;;  %v603_v22 = vcvt.f32.s32 %v602_v1  ;;  %vm226_vm12 = vcmp.eq.s32.totalorder %v217_v53, 0  ;;  %v383_v37 = vsel %vm367_vm1, %v381_v21, %v365_v34  ;;  %v213_v43 = vand.u32 1, %v833_v10 }
  0x3a   : > { %459 = vst [vmem:[%s978_s8 + $0x10] sm:$0xff] %v450_v9  ;;  %v251_v26 = vmul.f32 0.125, %v242_v58  ;;  %v353_v29 = vsel %vm336_vm0, %v350_v19, %v352_v59  ;;  %v364_v33 = vsel %vm336_vm0, %v352_v59, %v337_v30  ;;  %v373_v30 = vrot.slane %v926_v32, 7  ;;  %v435_v58 = vld [vmem:[%s1136_s1 + $0x28] sm:$0xff] }
  0x3b   : > { %v277_v12 = vand.u32 1, %v603_v22  ;;  %v419_v35 = vsel %vm226_vm12, %v353_v29, %v382_v31  ;;  %v420_v41 = vsel %vm227_vm13, %v364_v33, %v383_v37  ;;  %vm1009_vm15 = vcmp.eq.s32.totalorder %v213_v43, 0 }
  0x3c   : > { %v260_v40 = vfloor.f32 %v251_v26  ;;  %v428_v13 = vadd.f32 %v419_v35, %v965_v57  ;;  %v429_v44 = vadd.f32 %v420_v41, %v918_v28  ;;  %v374_v28 = vsel %vm367_vm1, %v371_v39, %v373_v30 }
  0x3d   : > { %vm286_vm14 = vcmp.eq.s32.totalorder %v277_v12, 0  ;;  %v214_v56 = vand.u32 1, %v908_v24  ;;  %v216_v57 = vand.u32 1, %v835_v11  ;;  %v348_v61 = vrot.slane %v970_v5, 1 }
  0x3e   : > { %v313_v45 = vsel %vm286_vm14, %v891_v17, %v866_v60  ;;  %v604_v34 = vtrunc.f32 %v260_v40  ;;  %v446_v46 = vmul.f32 %v437_v36, %v428_v13  ;;  %v447_v48 = vmul.f32 %v438_v42, %v429_v44 }
  0x3f   : > { %v322_v47 = vadd.f32 %v313_v45, %v874_v2  ;;  %vm1035_vm3 = vcmp.eq.s32.totalorder %v214_v56, 0  ;;  %vm1043_vm5 = vcmp.eq.s32.totalorder %v216_v57, 0  ;;  %v351_v14 = vsel %vm336_vm0, %v348_v61, %v350_v19  ;;  %v434_v19 = vld [vmem:[%s1136_s1 + $0x20] sm:$0xff] }
  0x40   : > { %v605_v49 = vcvt.f32.s32 %v604_v34  ;;  %v455_v50 = vadd.f32 %v446_v46, %v881_v8  ;;  %v456_v52 = vadd.f32 %v447_v48, %v877_v3  ;;  %v215_v8 = vand.u32 1, %v972_v7  ;;  %v433_v3 = vld [vmem:[%s1136_s1 + $0x18] sm:$0xff] }
  0x41   : > { %v344_v51 = vrot.slane %v322_v47, 1  ;;  %v375_v39 = vrot.slane %v322_v47, 7 }
  0x42   : > { %v278_v54 = vand.u32 1, %v605_v49  ;;  %464 = vst [vmem:[%s978_s8 + $0x38] sm:$0xff] %v455_v50  ;;  %465 = vst [vmem:[%s978_s8 + $0x40] sm:$0xff] %v456_v52  ;;  %vm1039_vm4 = vcmp.eq.s32.totalorder %v215_v8, 0 }
  0x43   : > { %v345_v55 = vsel %vm336_vm0, %v342_v38, %v344_v51  ;;  %v376_v6 = vsel %vm367_vm1, %v373_v30, %v375_v39 }
  0x44   : > { %v415_v27 = vsel %vm1009_vm15, %v345_v55, %v374_v28  ;;  %vm287_vm2 = vcmp.eq.s32.totalorder %v278_v54, 0 }
  0x45   : > { %v424_v38 = vadd.f32 %v415_v27, %v926_v32  ;;  %v314_v24 = vsel %vm287_vm2, %v911_v25, %v874_v2 }
  0x46   : > { %v323_v11 = vadd.f32 %v314_v24, %v891_v17 }
  0x47   : > { %v442_v62 = vmul.f32 %v433_v3, %v424_v38 }
  0x48   : > { %v346_v32 = vrot.slane %v323_v11, 1  ;;  %v377_v7 = vrot.slane %v323_v11, 7 }
  0x49   : > { %v451_v15 = vadd.f32 %v442_v62, %v866_v60 }
  0x4a   : > { %v347_v16 = vsel %vm336_vm0, %v344_v51, %v346_v32  ;;  %v349_v9 = vsel %vm336_vm0, %v346_v32, %v348_v61  ;;  %v378_v18 = vsel %vm367_vm1, %v375_v39, %v377_v7  ;;  %v380_v1 = vsel %vm367_vm1, %v377_v7, %v379_v20  ;;  %v436_v20 = vld [vmem:[%s1136_s1 + $0x30] sm:$0xff] }
  0x4b   : > { %460 = vst [vmem:[%s978_s8 + $0x18] sm:$0xff] %v451_v15  ;;  %v416_v53 = vsel %vm1035_vm3, %v347_v16, %v376_v6  ;;  %v417_v60 = vsel %vm1039_vm4, %v349_v9, %v378_v18  ;;  %v418_v59 = vsel %vm1043_vm5, %v351_v14, %v380_v1 }
  0x4c   : > { %v425_v21 = vadd.f32 %v416_v53, %v322_v47  ;;  %v426_v22 = vadd.f32 %v417_v60, %v323_v11  ;;  %v427_v23 = vadd.f32 %v418_v59, %v970_v5 }
  0x4e   : > { %v443_v26 = vmul.f32 %v434_v19, %v425_v21  ;;  %v444_v29 = vmul.f32 %v435_v58, %v426_v22  ;;  %v445_v31 = vmul.f32 %v436_v20, %v427_v23 }
  0x50   : > { %v452_v33 = vadd.f32 %v443_v26, %v874_v2  ;;  %v453_v12 = vadd.f32 %v444_v29, %v891_v17  ;;  %v454_v5 = vadd.f32 %v445_v31, %v911_v25 }
  0x52   : > { %461 = vst [vmem:[%s978_s8 + $0x20] sm:$0xff] %v452_v33  ;;  %462 = vst [vmem:[%s978_s8 + $0x28] sm:$0xff] %v453_v12 }
  0x53   : > { %463 = vst [vmem:[%s978_s8 + $0x30] sm:$0xff] %v454_v5 }
  0x54   : > { %683 = shalt.err (!%p680_p5)
}
  0x55   : > { %s684_s28 = scalar_lea.hbm %s1078_s15, 1152  ;;  %s688_s25 = scalar_lea.hbm %s1137_s2, 2304 }
  0x56   : > { %p685_p6 = scmp.ne.s32.totalorder %s1078_s15, %s684_s28  ;;  %p689_p10 = scmp.lt.s32.totalorder %s1078_s15, %s1137_s2 }
  0x57   : > { %p690_p11 = scmp.lt.s32.totalorder %s688_s25, %s684_s28 }
  0x58   : > { %p686_p7 = pnand %p685_p6, %p806_p4 }
  0x59   : > { %p691_p12 = por %p690_p11, %p689_p10 }
  0x5a   : > { %p687_p9 = pneg %p686_p7 }
  0x5c   : > { %p692_p13 = pnand %p691_p12, %p687_p9 }
  0x5e   : > { %695 = shalt.err (!%p692_p13)
}
  0x5f   : > { %s749_s29 = smov 128   ;;  %s750_s30 = smov 8  }
  0x60   : > { %613 = dma.vmem_to_hbm [thread:$0]  (%p806_p4), %s1080_s5, 1152, %s1078_s15, %s1090_s12, %s749_s29, %s749_s29, %s750_s30  }
  0x61 PF: > { %p619_p0 = scmp.ge.s32.totalorder %s746_s14, 2  ;;  %s496_s3 = sand.u32 1, %s726_s9  }
  0x62   : > { %s497_s4 = scalar_lea.sflag [#allocation3], %s496_s3 }
  0x63   : > { %p616_p1 = pnand %p619_p0, %p813_p8 }
  0x65   : > { %p617_p2 = pneg %p616_p1 }
  0x67   : > { %721 = dma.done.wait (%p617_p2), %s497_s4, 1152  }
  0x68   : > { %723 = vsyncadd (%p617_p2), %s497_s4, 4294966144  ;;  %s15_s14 = sadd.s32 1, %s746_s14   ;;  %s1154_s9 = smov %s730_s10 }
  0x69   : > { %p12_p3 = scmp.ge.s32.totalorder %s15_s14, 4   ;;  %s1155_s10 = smov %s734_s11 }
  0x6a   : > { %s1156_s11 = smov %s819_s22  ;;  %s1157_s12 = smov %s742_s13 }
  0x6b   : > { %s1158_s13 = smov %s1160_s17  ;;  %14 = sbr.rel (!%p12_p3) target bundleno = 4 (0x4), region = 66 }
  0x70   :  { %502 = vsyncpa [#allocation3], 1 }
  0x71   :  { %504 = vsyncpa [#allocation3 + $0x1], 1 }

</bundles_post_ra>
